<compile_context>
chip_gen: v7x
topology: tpu7x:2x2x1
jax: 0.10.0
libtpu: 0.0.40
codegen_flags: <defaults>
</compile_context>

<pallas_src>
import functools

import jax
import jax.numpy as jnp
from jax import lax
from jax.experimental import pallas as pl
from jax.experimental.pallas import tpu as pltpu


def _sigmoid(x):
    return 1.0 / (1.0 + jnp.exp(-x))


def _silu(x):
    return x * _sigmoid(x)


def dsconv_kernel(x_ref, wdw_ref, b1_ref, wr_ref, br_ref, we_ref, be_ref,
                  wpw_ref, b2_ref, out_ref, *, H, W, has_skip):
    _, C, HW = x_ref.shape
    Cout = out_ref.shape[1]

    # ---- depthwise 3x3 conv, lane-dense (C, H*W) layout ---------------------
    # Each tap is a lane rotation (XLU) of the flattened image; pixels whose
    # source would fall outside the HxW image (row / column wrap of the circular
    # rotation) are masked to zero, reproducing the conv's zero padding.
    xf = x_ref[0]                                    # (C, HW): single read of x
    wdw = wdw_ref[...]                               # (C, 9), BN1 scale pre-folded

    lane = lax.broadcasted_iota(jnp.int32, (1, HW), 1)
    col = (jnp.bitwise_and(lane, W - 1) if (W & (W - 1)) == 0 else lane % W)
    row_ok = {-1: lane >= W, 0: None, 1: lane < (H - 1) * W}
    col_ok = {-1: col >= 1, 0: None, 1: col <= W - 2}

    acc = xf * wdw[:, 4:5]                           # center tap initialises acc
    for dy in (-1, 0, 1):
        for dx in (-1, 0, 1):
            if dy == 0 and dx == 0:
                continue
            s = dy * W + dx                          # want tap[i] == xf[i + s]
            tap = pltpu.roll(xf, (-s) % HW, axis=1)  # roll(x,k)[i] = x[(i-k)%n]
            m, mc = row_ok[dy], col_ok[dx]
            m = mc if m is None else (m if mc is None else jnp.logical_and(m, mc))
            tap = jnp.where(m, tap, 0.0)
            k = (dy + 1) * 3 + (dx + 1)
            acc = acc + tap * wdw[:, k:k + 1]

    # ---- BN1 bias + SiLU -----------------------------------------------------
    y = _silu(acc + b1_ref[...])                     # (C, HW)

    # ---- Squeeze-and-Excite (VPU broadcasts + XLU reductions; no MXU) --------
    pooled = jnp.mean(y, axis=1, keepdims=True)                      # (C, 1)
    red = jnp.sum(wr_ref[...] * pooled, axis=0, keepdims=True)       # (1, Cr)
    red = _silu(red + br_ref[...])
    pre = jnp.sum(we_ref[...] * red, axis=1, keepdims=True)          # (C, 1)
    gate = _sigmoid(pre + be_ref[...])
    y = y * gate                                                     # (C, HW)

    # ---- pointwise 1x1 conv (BN2 scale pre-folded), all f32 ------------------
    wpw = wpw_ref[...]                                               # (Cout, C)
    if C <= 16 and Cout <= 16:
        # tiny channel count: unrolled VPU broadcast-multiply, skip the MXU
        z = y[0:1, :] * wpw[:, 0:1]
        for c in range(1, C):
            z = z + y[c:c + 1, :] * wpw[:, c:c + 1]
    else:
        # TODO(synk): pad C/Cout to the MXU tile (128/256) for real stages.
        z = jnp.dot(wpw, y, preferred_element_type=jnp.float32)      # (Cout, HW)
    z = z + b2_ref[...]                                              # BN2 bias

    # ---- residual skip (stride=1, in_ch==out_ch) ------------------------------
    if has_skip:
        z = z + x_ref[0]           # re-read the resident VMEM block (no live copy)
    out_ref[0] = z                 # lane-dense (Cout, HW) store


def depthwise_separable_conv2d(x_nchw, p, eps=1e-5):
    """x_nchw: (N, C, H, W) float32. Returns (N, Cout, H, W)."""
    N, C, H, W = x_nchw.shape
    Cout = p["w_pw"].shape[0]
    Cr = p["w_r"].shape[0]
    HW = H * W
    has_skip = (Cout == C)         # stride is always 1 in this kernel

    # NCHW -> (N, C, H*W) is a free reshape (no transpose): the lane dim becomes
    # the spatial size, keeping every vreg / store lane-dense even for tiny C.
    x = x_nchw.reshape(N, C, HW)

    # fold BN params (eval mode)
    s1 = p["gamma1"] / jnp.sqrt(p["var1"] + eps)
    b1 = p["beta1"] - p["mean1"] * s1
    s2 = p["gamma2"] / jnp.sqrt(p["var2"] + eps)
    b2 = p["beta2"] - p["mean2"] * s2

    # fold BN scales into the conv weights (all f32: no bf16 accuracy loss)
    wdw = (p["w_dw"].reshape(C, 9) * s1[:, None]).astype(jnp.float32)      # (C, 9)
    wpw = (p["w_pw"].reshape(Cout, C) * s2[:, None]).astype(jnp.float32)   # (Cout, C)
    wr = p["w_r"].T.astype(jnp.float32)                                    # (C, Cr)
    we = p["w_e"].astype(jnp.float32)                                      # (C, Cr)

    colv = lambda v: v.reshape(-1, 1).astype(jnp.float32)   # per-channel (sublane) vec
    rowv = lambda v: v.reshape(1, -1).astype(jnp.float32)   # per-lane vec

    flops = N * (2 * 9 * HW * C + 2 * HW * C * Cout + 4 * C * Cr)
    transcendentals = N * (HW * C + C + Cr)
    bytes_accessed = (4 * x.size + 4 * N * HW * Cout
                      + 4 * (9 * C + C + 2 * C * Cr + Cr + C + Cout * C + Cout))

    kernel = functools.partial(dsconv_kernel, H=H, W=W, has_skip=has_skip)

    out = pl.pallas_call(
        kernel,
        out_shape=jax.ShapeDtypeStruct((N, Cout, HW), x.dtype),
        grid_spec=pltpu.PrefetchScalarGridSpec(
            num_scalar_prefetch=0,
            grid=(N,),
            in_specs=[
                pl.BlockSpec((1, C, HW), lambda n: (n, 0, 0)),
                pl.BlockSpec((C, 9), lambda n: (0, 0)),
                pl.BlockSpec((C, 1), lambda n: (0, 0)),
                pl.BlockSpec((C, Cr), lambda n: (0, 0)),
                pl.BlockSpec((1, Cr), lambda n: (0, 0)),
                pl.BlockSpec((C, Cr), lambda n: (0, 0)),
                pl.BlockSpec((C, 1), lambda n: (0, 0)),
                pl.BlockSpec((Cout, C), lambda n: (0, 0)),
                pl.BlockSpec((Cout, 1), lambda n: (0, 0)),
            ],
            out_specs=pl.BlockSpec((1, Cout, HW), lambda n: (n, 0, 0)),
        ),
        compiler_params=pltpu.CompilerParams(
            # batch axis is parallel -> shards across the 2 TensorCores on v7x
            dimension_semantics=("parallel",),
            # no hard 32 MiB cap (actual use here is a few hundred KiB).
            # TODO(synk): when H-strip tiling is added for real MBConv shapes,
            #             budget <= ~48 MiB on v7x (64 MiB physical VMEM).
            vmem_limit_bytes=64 * 1024 * 1024),
        cost_estimate=pl.CostEstimate(flops=flops,
                                      transcendentals=transcendentals,
                                      bytes_accessed=bytes_accessed),
    )(x, wdw, colv(b1), wr, rowv(p["b_r"]), we, colv(p["b_e"]), wpw, colv(b2))

    return out.reshape(N, Cout, H, W)


def reference(x_nchw, p, eps=1e-5):
    """Pure-JAX reference (independent of the kernel) for correctness check."""
    N, C, H, W = x_nchw.shape
    Cout = p["w_pw"].shape[0]
    x = jnp.transpose(x_nchw, (0, 2, 3, 1))                        # NHWC
    w_hwio = jnp.transpose(p["w_dw"], (2, 3, 1, 0))                # (3,3,1,C)
    y = lax.conv_general_dilated(x, w_hwio, (1, 1), "SAME",
                                 dimension_numbers=("NHWC", "HWIO", "NHWC"),
                                 feature_group_count=C)
    y = (y - p["mean1"]) / jnp.sqrt(p["var1"] + eps) * p["gamma1"] + p["beta1"]
    y = jax.nn.silu(y)
    pooled = y.mean((1, 2), keepdims=True)                         # (N,1,1,C)
    red = jnp.einsum("nhwc,rc->nhwr", pooled, p["w_r"]) + p["b_r"]
    red = jax.nn.silu(red)
    gate = jax.nn.sigmoid(jnp.einsum("nhwr,cr->nhwc", red, p["w_e"]) + p["b_e"])
    y = y * gate
    z = jnp.einsum("nhwc,oc->nhwo", y, p["w_pw"].reshape(Cout, C))
    z = (z - p["mean2"]) / jnp.sqrt(p["var2"] + eps) * p["gamma2"] + p["beta2"]
    z = z + x
    return jnp.transpose(z, (0, 3, 1, 2))


if __name__ == "__main__":
    key = jax.random.PRNGKey(0)
    N, C, H, W = 2, 4, 16, 16
    Cout = C                                   # in_ch == out_ch -> has_skip
    Cr = int(C * 0.25 / 1)                     # SE reduced channels
    ks = jax.random.split(key, 16)

    x = jax.random.normal(ks[0], (N, C, H, W), jnp.float32)

    params = {
        "w_dw":  0.3 * jax.random.normal(ks[1], (C, 1, 3, 3), jnp.float32),
        "gamma1": 1.0 + 0.1 * jax.random.normal(ks[2], (C,), jnp.float32),
        "beta1":  0.1 * jax.random.normal(ks[3], (C,), jnp.float32),
        "mean1":  0.05 * jax.random.normal(ks[4], (C,), jnp.float32),
        "var1":   1.0 + 0.1 * jnp.abs(jax.random.normal(ks[5], (C,), jnp.float32)),
        "w_r":   0.3 * jax.random.normal(ks[6], (Cr, C), jnp.float32),
        "b_r":   0.1 * jax.random.normal(ks[7], (Cr,), jnp.float32),
        "w_e":   0.3 * jax.random.normal(ks[8], (C, Cr), jnp.float32),
        "b_e":   0.1 * jax.random.normal(ks[9], (C,), jnp.float32),
        "w_pw":  0.3 * jax.random.normal(ks[10], (Cout, C, 1, 1), jnp.float32),
        "gamma2": 1.0 + 0.1 * jax.random.normal(ks[11], (Cout,), jnp.float32),
        "beta2":  0.1 * jax.random.normal(ks[12], (Cout,), jnp.float32),
        "mean2":  0.05 * jax.random.normal(ks[13], (Cout,), jnp.float32),
        "var2":   1.0 + 0.1 * jnp.abs(jax.random.normal(ks[14], (Cout,), jnp.float32)),
    }

    out = depthwise_separable_conv2d(x, params)
    out = jax.block_until_ready(out)

    ref = jax.block_until_ready(reference(x, params))
    assert out.shape == (N, Cout, H, W)
    # all-f32 kernel (no bf16 pointwise path at this channel count) -> tight tolerance
    assert jnp.allclose(out, ref, rtol=1e-3, atol=1e-3), \
        f"max abs err = {jnp.max(jnp.abs(out - ref))}"

    print("KERNEL_OK")
</pallas_src>

<mosaic_0001>
module attributes {stable_mosaic.version = 11 : i64} {
  func.func @dsconv_kernel(%arg0: i32, %arg1: memref<1x4x256xf32, #tpu.memory_space<vmem>>, %arg2: memref<4x9xf32, #tpu.memory_space<vmem>>, %arg3: memref<4x1xf32, #tpu.memory_space<vmem>>, %arg4: memref<4x1xf32, #tpu.memory_space<vmem>>, %arg5: memref<1x1xf32, #tpu.memory_space<vmem>>, %arg6: memref<4x1xf32, #tpu.memory_space<vmem>>, %arg7: memref<4x1xf32, #tpu.memory_space<vmem>>, %arg8: memref<4x4xf32, #tpu.memory_space<vmem>>, %arg9: memref<4x1xf32, #tpu.memory_space<vmem>>, %arg10: memref<1x4x256xf32, #tpu.memory_space<vmem>>) attributes {dimension_semantics = [#tpu.dimension_semantics<parallel>], iteration_bounds = array<i64: 2>, scalar_prefetch = 0 : i64, scratch_operands = 0 : i64, tpu.core_type = #tpu.core_type<tc>, window_params = [{transform_indices = @transform_0, window_bounds = array<i64: 1, 4, 256>}, {pipeline_mode = #tpu.pipeline_mode<synchronous>, transform_indices = @transform_1, window_bounds = array<i64: 4, 9>}, {pipeline_mode = #tpu.pipeline_mode<synchronous>, transform_indices = @transform_2, window_bounds = array<i64: 4, 1>}, {pipeline_mode = #tpu.pipeline_mode<synchronous>, transform_indices = @transform_3, window_bounds = array<i64: 4, 1>}, {pipeline_mode = #tpu.pipeline_mode<synchronous>, transform_indices = @transform_4, window_bounds = array<i64: 1, 1>}, {pipeline_mode = #tpu.pipeline_mode<synchronous>, transform_indices = @transform_5, window_bounds = array<i64: 4, 1>}, {pipeline_mode = #tpu.pipeline_mode<synchronous>, transform_indices = @transform_6, window_bounds = array<i64: 4, 1>}, {pipeline_mode = #tpu.pipeline_mode<synchronous>, transform_indices = @transform_7, window_bounds = array<i64: 4, 4>}, {pipeline_mode = #tpu.pipeline_mode<synchronous>, transform_indices = @transform_8, window_bounds = array<i64: 4, 1>}, {transform_indices = @transform_9, window_bounds = array<i64: 1, 4, 256>}]} {
    %c0 = arith.constant 0 : index
    %c0_0 = arith.constant 0 : index
    %c0_1 = arith.constant 0 : index
    %0 = vector.load %arg1[%c0, %c0_0, %c0_1] : memref<1x4x256xf32, #tpu.memory_space<vmem>>, vector<1x4x256xf32>
    %1 = vector.shape_cast %0 : vector<1x4x256xf32> to vector<4x256xf32>
    %c0_2 = arith.constant 0 : index
    %c0_3 = arith.constant 0 : index
    %2 = vector.load %arg2[%c0_2, %c0_3] : memref<4x9xf32, #tpu.memory_space<vmem>>, vector<4x9xf32>
    %3 = tpu.iota {dimensions = array<i32: 1>} : vector<1x256xi32>
    %c15_i32 = arith.constant 15 : i32
    %4 = vector.broadcast %c15_i32 : i32 to vector<1x256xi32>
    %5 = arith.andi %3, %4 : vector<1x256xi32>
    %c16_i32 = arith.constant 16 : i32
    %6 = vector.broadcast %c16_i32 : i32 to vector<1x256xi32>
    %7 = arith.cmpi sge, %3, %6 : vector<1x256xi32>
    %c240_i32 = arith.constant 240 : i32
    %8 = vector.broadcast %c240_i32 : i32 to vector<1x256xi32>
    %9 = arith.cmpi slt, %3, %8 : vector<1x256xi32>
    %c1_i32 = arith.constant 1 : i32
    %10 = vector.broadcast %c1_i32 : i32 to vector<1x256xi32>
    %11 = arith.cmpi sge, %5, %10 : vector<1x256xi32>
    %c14_i32 = arith.constant 14 : i32
    %12 = vector.broadcast %c14_i32 : i32 to vector<1x256xi32>
    %13 = arith.cmpi sle, %5, %12 : vector<1x256xi32>
    %14 = vector.extract_strided_slice %2 {offsets = [0, 4], sizes = [4, 1], strides = [1, 1]} : vector<4x9xf32> to vector<4x1xf32>
    %15 = vector.broadcast %14 : vector<4x1xf32> to vector<4x256xf32>
    %16 = arith.mulf %1, %15 : vector<4x256xf32>
    %c17_i32 = arith.constant 17 : i32
    %17 = tpu.dynamic_rotate %1 by %c17_i32 dim 1 : vector<4x256xf32>, i32 -> vector<4x256xf32>
    %18 = arith.andi %7, %11 : vector<1x256xi1>
    %cst = arith.constant 0.000000e+00 : f32
    %19 = vector.shape_cast %18 : vector<1x256xi1> to vector<1x256xi1>
    %20 = vector.broadcast %19 : vector<1x256xi1> to vector<4x256xi1>
    %21 = vector.broadcast %cst : f32 to vector<4x256xf32>
    %22 = arith.select %20, %17, %21 : vector<4x256xi1>, vector<4x256xf32>
    %23 = vector.extract_strided_slice %2 {offsets = [0, 0], sizes = [4, 1], strides = [1, 1]} : vector<4x9xf32> to vector<4x1xf32>
    %24 = vector.broadcast %23 : vector<4x1xf32> to vector<4x256xf32>
    %25 = arith.mulf %22, %24 : vector<4x256xf32>
    %26 = arith.addf %16, %25 : vector<4x256xf32>
    %c16_i32_4 = arith.constant 16 : i32
    %27 = tpu.dynamic_rotate %1 by %c16_i32_4 dim 1 : vector<4x256xf32>, i32 -> vector<4x256xf32>
    %cst_5 = arith.constant 0.000000e+00 : f32
    %28 = vector.shape_cast %7 : vector<1x256xi1> to vector<1x256xi1>
    %29 = vector.broadcast %28 : vector<1x256xi1> to vector<4x256xi1>
    %30 = vector.broadcast %cst_5 : f32 to vector<4x256xf32>
    %31 = arith.select %29, %27, %30 : vector<4x256xi1>, vector<4x256xf32>
    %32 = vector.extract_strided_slice %2 {offsets = [0, 1], sizes = [4, 1], strides = [1, 1]} : vector<4x9xf32> to vector<4x1xf32>
    %33 = vector.broadcast %32 : vector<4x1xf32> to vector<4x256xf32>
    %34 = arith.mulf %31, %33 : vector<4x256xf32>
    %35 = arith.addf %26, %34 : vector<4x256xf32>
    %c15_i32_6 = arith.constant 15 : i32
    %36 = tpu.dynamic_rotate %1 by %c15_i32_6 dim 1 : vector<4x256xf32>, i32 -> vector<4x256xf32>
    %37 = arith.andi %7, %13 : vector<1x256xi1>
    %cst_7 = arith.constant 0.000000e+00 : f32
    %38 = vector.shape_cast %37 : vector<1x256xi1> to vector<1x256xi1>
    %39 = vector.broadcast %38 : vector<1x256xi1> to vector<4x256xi1>
    %40 = vector.broadcast %cst_7 : f32 to vector<4x256xf32>
    %41 = arith.select %39, %36, %40 : vector<4x256xi1>, vector<4x256xf32>
    %42 = vector.extract_strided_slice %2 {offsets = [0, 2], sizes = [4, 1], strides = [1, 1]} : vector<4x9xf32> to vector<4x1xf32>
    %43 = vector.broadcast %42 : vector<4x1xf32> to vector<4x256xf32>
    %44 = arith.mulf %41, %43 : vector<4x256xf32>
    %45 = arith.addf %35, %44 : vector<4x256xf32>
    %c1_i32_8 = arith.constant 1 : i32
    %46 = tpu.dynamic_rotate %1 by %c1_i32_8 dim 1 : vector<4x256xf32>, i32 -> vector<4x256xf32>
    %cst_9 = arith.constant 0.000000e+00 : f32
    %47 = vector.shape_cast %11 : vector<1x256xi1> to vector<1x256xi1>
    %48 = vector.broadcast %47 : vector<1x256xi1> to vector<4x256xi1>
    %49 = vector.broadcast %cst_9 : f32 to vector<4x256xf32>
    %50 = arith.select %48, %46, %49 : vector<4x256xi1>, vector<4x256xf32>
    %51 = vector.extract_strided_slice %2 {offsets = [0, 3], sizes = [4, 1], strides = [1, 1]} : vector<4x9xf32> to vector<4x1xf32>
    %52 = vector.broadcast %51 : vector<4x1xf32> to vector<4x256xf32>
    %53 = arith.mulf %50, %52 : vector<4x256xf32>
    %54 = arith.addf %45, %53 : vector<4x256xf32>
    %c255_i32 = arith.constant 255 : i32
    %55 = tpu.dynamic_rotate %1 by %c255_i32 dim 1 : vector<4x256xf32>, i32 -> vector<4x256xf32>
    %cst_10 = arith.constant 0.000000e+00 : f32
    %56 = vector.shape_cast %13 : vector<1x256xi1> to vector<1x256xi1>
    %57 = vector.broadcast %56 : vector<1x256xi1> to vector<4x256xi1>
    %58 = vector.broadcast %cst_10 : f32 to vector<4x256xf32>
    %59 = arith.select %57, %55, %58 : vector<4x256xi1>, vector<4x256xf32>
    %60 = vector.extract_strided_slice %2 {offsets = [0, 5], sizes = [4, 1], strides = [1, 1]} : vector<4x9xf32> to vector<4x1xf32>
    %61 = vector.broadcast %60 : vector<4x1xf32> to vector<4x256xf32>
    %62 = arith.mulf %59, %61 : vector<4x256xf32>
    %63 = arith.addf %54, %62 : vector<4x256xf32>
    %c241_i32 = arith.constant 241 : i32
    %64 = tpu.dynamic_rotate %1 by %c241_i32 dim 1 : vector<4x256xf32>, i32 -> vector<4x256xf32>
    %65 = arith.andi %9, %11 : vector<1x256xi1>
    %cst_11 = arith.constant 0.000000e+00 : f32
    %66 = vector.shape_cast %65 : vector<1x256xi1> to vector<1x256xi1>
    %67 = vector.broadcast %66 : vector<1x256xi1> to vector<4x256xi1>
    %68 = vector.broadcast %cst_11 : f32 to vector<4x256xf32>
    %69 = arith.select %67, %64, %68 : vector<4x256xi1>, vector<4x256xf32>
    %70 = vector.extract_strided_slice %2 {offsets = [0, 6], sizes = [4, 1], strides = [1, 1]} : vector<4x9xf32> to vector<4x1xf32>
    %71 = vector.broadcast %70 : vector<4x1xf32> to vector<4x256xf32>
    %72 = arith.mulf %69, %71 : vector<4x256xf32>
    %73 = arith.addf %63, %72 : vector<4x256xf32>
    %c240_i32_12 = arith.constant 240 : i32
    %74 = tpu.dynamic_rotate %1 by %c240_i32_12 dim 1 : vector<4x256xf32>, i32 -> vector<4x256xf32>
    %cst_13 = arith.constant 0.000000e+00 : f32
    %75 = vector.shape_cast %9 : vector<1x256xi1> to vector<1x256xi1>
    %76 = vector.broadcast %75 : vector<1x256xi1> to vector<4x256xi1>
    %77 = vector.broadcast %cst_13 : f32 to vector<4x256xf32>
    %78 = arith.select %76, %74, %77 : vector<4x256xi1>, vector<4x256xf32>
    %79 = vector.extract_strided_slice %2 {offsets = [0, 7], sizes = [4, 1], strides = [1, 1]} : vector<4x9xf32> to vector<4x1xf32>
    %80 = vector.broadcast %79 : vector<4x1xf32> to vector<4x256xf32>
    %81 = arith.mulf %78, %80 : vector<4x256xf32>
    %82 = arith.addf %73, %81 : vector<4x256xf32>
    %c239_i32 = arith.constant 239 : i32
    %83 = tpu.dynamic_rotate %1 by %c239_i32 dim 1 : vector<4x256xf32>, i32 -> vector<4x256xf32>
    %84 = arith.andi %9, %13 : vector<1x256xi1>
    %cst_14 = arith.constant 0.000000e+00 : f32
    %85 = vector.shape_cast %84 : vector<1x256xi1> to vector<1x256xi1>
    %86 = vector.broadcast %85 : vector<1x256xi1> to vector<4x256xi1>
    %87 = vector.broadcast %cst_14 : f32 to vector<4x256xf32>
    %88 = arith.select %86, %83, %87 : vector<4x256xi1>, vector<4x256xf32>
    %89 = vector.extract_strided_slice %2 {offsets = [0, 8], sizes = [4, 1], strides = [1, 1]} : vector<4x9xf32> to vector<4x1xf32>
    %90 = vector.broadcast %89 : vector<4x1xf32> to vector<4x256xf32>
    %91 = arith.mulf %88, %90 : vector<4x256xf32>
    %92 = arith.addf %82, %91 : vector<4x256xf32>
    %c0_15 = arith.constant 0 : index
    %c0_16 = arith.constant 0 : index
    %93 = vector.load %arg3[%c0_15, %c0_16] : memref<4x1xf32, #tpu.memory_space<vmem>>, vector<4x1xf32>
    %94 = vector.broadcast %93 : vector<4x1xf32> to vector<4x256xf32>
    %95 = arith.addf %92, %94 : vector<4x256xf32>
    %cst_17 = arith.constant 0.000000e+00 : f32
    %96 = vector.broadcast %cst_17 : f32 to vector<4x256xf32>
    %97 = arith.subf %96, %95 : vector<4x256xf32>
    %98 = math.exp %97 : vector<4x256xf32>
    %cst_18 = arith.constant 1.000000e+00 : f32
    %99 = vector.broadcast %cst_18 : f32 to vector<4x256xf32>
    %100 = arith.addf %99, %98 : vector<4x256xf32>
    %cst_19 = arith.constant 1.000000e+00 : f32
    %101 = vector.broadcast %cst_19 : f32 to vector<4x256xf32>
    %102 = arith.divf %101, %100 : vector<4x256xf32>
    %103 = arith.mulf %95, %102 : vector<4x256xf32>
    %cst_20 = arith.constant dense<0.000000e+00> : vector<4xf32>
    %104 = vector.multi_reduction <add>, %103, %cst_20 [1] : vector<4x256xf32> to vector<4xf32>
    %105 = vector.shape_cast %104 : vector<4xf32> to vector<4x1xf32>
    %cst_21 = arith.constant 2.560000e+02 : f32
    %106 = vector.broadcast %cst_21 : f32 to vector<4x1xf32>
    %107 = arith.divf %105, %106 : vector<4x1xf32>
    %c0_22 = arith.constant 0 : index
    %c0_23 = arith.constant 0 : index
    %108 = vector.load %arg4[%c0_22, %c0_23] : memref<4x1xf32, #tpu.memory_space<vmem>>, vector<4x1xf32>
    %109 = arith.mulf %108, %107 : vector<4x1xf32>
    %cst_24 = arith.constant dense<0.000000e+00> : vector<1xf32>
    %110 = vector.multi_reduction <add>, %109, %cst_24 [0] : vector<4x1xf32> to vector<1xf32>
    %111 = vector.shape_cast %110 : vector<1xf32> to vector<1x1xf32>
    %c0_25 = arith.constant 0 : index
    %c0_26 = arith.constant 0 : index
    %112 = vector.load %arg5[%c0_25, %c0_26] : memref<1x1xf32, #tpu.memory_space<vmem>>, vector<1x1xf32>
    %113 = arith.addf %111, %112 : vector<1x1xf32>
    %cst_27 = arith.constant 0.000000e+00 : f32
    %114 = vector.broadcast %cst_27 : f32 to vector<1x1xf32>
    %115 = arith.subf %114, %113 : vector<1x1xf32>
    %116 = math.exp %115 : vector<1x1xf32>
    %cst_28 = arith.constant 1.000000e+00 : f32
    %117 = vector.broadcast %cst_28 : f32 to vector<1x1xf32>
    %118 = arith.addf %117, %116 : vector<1x1xf32>
    %cst_29 = arith.constant 1.000000e+00 : f32
    %119 = vector.broadcast %cst_29 : f32 to vector<1x1xf32>
    %120 = arith.divf %119, %118 : vector<1x1xf32>
    %121 = arith.mulf %113, %120 : vector<1x1xf32>
    %c0_30 = arith.constant 0 : index
    %c0_31 = arith.constant 0 : index
    %122 = vector.load %arg6[%c0_30, %c0_31] : memref<4x1xf32, #tpu.memory_space<vmem>>, vector<4x1xf32>
    %123 = vector.broadcast %121 : vector<1x1xf32> to vector<4x1xf32>
    %124 = arith.mulf %122, %123 : vector<4x1xf32>
    %cst_32 = arith.constant dense<0.000000e+00> : vector<4xf32>
    %125 = vector.multi_reduction <add>, %124, %cst_32 [1] : vector<4x1xf32> to vector<4xf32>
    %126 = vector.shape_cast %125 : vector<4xf32> to vector<4x1xf32>
    %c0_33 = arith.constant 0 : index
    %c0_34 = arith.constant 0 : index
    %127 = vector.load %arg7[%c0_33, %c0_34] : memref<4x1xf32, #tpu.memory_space<vmem>>, vector<4x1xf32>
    %128 = arith.addf %126, %127 : vector<4x1xf32>
    %cst_35 = arith.constant 0.000000e+00 : f32
    %129 = vector.broadcast %cst_35 : f32 to vector<4x1xf32>
    %130 = arith.subf %129, %128 : vector<4x1xf32>
    %131 = math.exp %130 : vector<4x1xf32>
    %cst_36 = arith.constant 1.000000e+00 : f32
    %132 = vector.broadcast %cst_36 : f32 to vector<4x1xf32>
    %133 = arith.addf %132, %131 : vector<4x1xf32>
    %cst_37 = arith.constant 1.000000e+00 : f32
    %134 = vector.broadcast %cst_37 : f32 to vector<4x1xf32>
    %135 = arith.divf %134, %133 : vector<4x1xf32>
    %136 = vector.broadcast %135 : vector<4x1xf32> to vector<4x256xf32>
    %137 = arith.mulf %103, %136 : vector<4x256xf32>
    %c0_38 = arith.constant 0 : index
    %c0_39 = arith.constant 0 : index
    %138 = vector.load %arg8[%c0_38, %c0_39] : memref<4x4xf32, #tpu.memory_space<vmem>>, vector<4x4xf32>
    %139 = vector.extract_strided_slice %137 {offsets = [0, 0], sizes = [1, 256], strides = [1, 1]} : vector<4x256xf32> to vector<1x256xf32>
    %140 = vector.extract_strided_slice %138 {offsets = [0, 0], sizes = [4, 1], strides = [1, 1]} : vector<4x4xf32> to vector<4x1xf32>
    %141 = vector.broadcast %139 : vector<1x256xf32> to vector<4x256xf32>
    %142 = vector.broadcast %140 : vector<4x1xf32> to vector<4x256xf32>
    %143 = arith.mulf %141, %142 : vector<4x256xf32>
    %144 = vector.extract_strided_slice %137 {offsets = [1, 0], sizes = [1, 256], strides = [1, 1]} : vector<4x256xf32> to vector<1x256xf32>
    %145 = vector.extract_strided_slice %138 {offsets = [0, 1], sizes = [4, 1], strides = [1, 1]} : vector<4x4xf32> to vector<4x1xf32>
    %146 = vector.broadcast %144 : vector<1x256xf32> to vector<4x256xf32>
    %147 = vector.broadcast %145 : vector<4x1xf32> to vector<4x256xf32>
    %148 = arith.mulf %146, %147 : vector<4x256xf32>
    %149 = arith.addf %143, %148 : vector<4x256xf32>
    %150 = vector.extract_strided_slice %137 {offsets = [2, 0], sizes = [1, 256], strides = [1, 1]} : vector<4x256xf32> to vector<1x256xf32>
    %151 = vector.extract_strided_slice %138 {offsets = [0, 2], sizes = [4, 1], strides = [1, 1]} : vector<4x4xf32> to vector<4x1xf32>
    %152 = vector.broadcast %150 : vector<1x256xf32> to vector<4x256xf32>
    %153 = vector.broadcast %151 : vector<4x1xf32> to vector<4x256xf32>
    %154 = arith.mulf %152, %153 : vector<4x256xf32>
    %155 = arith.addf %149, %154 : vector<4x256xf32>
    %156 = vector.extract_strided_slice %137 {offsets = [3, 0], sizes = [1, 256], strides = [1, 1]} : vector<4x256xf32> to vector<1x256xf32>
    %157 = vector.extract_strided_slice %138 {offsets = [0, 3], sizes = [4, 1], strides = [1, 1]} : vector<4x4xf32> to vector<4x1xf32>
    %158 = vector.broadcast %156 : vector<1x256xf32> to vector<4x256xf32>
    %159 = vector.broadcast %157 : vector<4x1xf32> to vector<4x256xf32>
    %160 = arith.mulf %158, %159 : vector<4x256xf32>
    %161 = arith.addf %155, %160 : vector<4x256xf32>
    %c0_40 = arith.constant 0 : index
    %c0_41 = arith.constant 0 : index
    %162 = vector.load %arg9[%c0_40, %c0_41] : memref<4x1xf32, #tpu.memory_space<vmem>>, vector<4x1xf32>
    %163 = vector.broadcast %162 : vector<4x1xf32> to vector<4x256xf32>
    %164 = arith.addf %161, %163 : vector<4x256xf32>
    %c0_42 = arith.constant 0 : index
    %c0_43 = arith.constant 0 : index
    %c0_44 = arith.constant 0 : index
    %165 = vector.load %arg1[%c0_42, %c0_43, %c0_44] : memref<1x4x256xf32, #tpu.memory_space<vmem>>, vector<1x4x256xf32>
    %166 = vector.shape_cast %165 : vector<1x4x256xf32> to vector<4x256xf32>
    %167 = arith.addf %164, %166 : vector<4x256xf32>
    %c0_45 = arith.constant 0 : index
    %c0_46 = arith.constant 0 : index
    %c0_47 = arith.constant 0 : index
    %168 = vector.load %arg10[%c0_45, %c0_46, %c0_47] : memref<1x4x256xf32, #tpu.memory_space<vmem>>, vector<1x4x256xf32>
    %169 = vector.shape_cast %168 : vector<1x4x256xf32> to vector<4x256xf32>
    %170 = vector.shape_cast %167 : vector<4x256xf32> to vector<1x4x256xf32>
    tpu.vector_store %arg10[%c0_45, %c0_46, %c0_47], %170 {strides = array<i32>} : memref<1x4x256xf32, #tpu.memory_space<vmem>>, vector<1x4x256xf32>,
    return
  }
  func.func @transform_0(%arg0: i32) -> (i32, i32, i32) {
    %c0_i32 = arith.constant 0 : i32
    %c0_i32_0 = arith.constant 0 : i32
    %c0_i32_1 = arith.constant 0 : i32
    return %arg0, %c0_i32, %c0_i32_0 : i32, i32, i32
  }
  func.func @transform_1(%arg0: i32) -> (i32, i32) {
    %c0_i32 = arith.constant 0 : i32
    %c0_i32_0 = arith.constant 0 : i32
    %c0_i32_1 = arith.constant 0 : i32
    return %c0_i32, %c0_i32_0 : i32, i32
  }
  func.func @transform_2(%arg0: i32) -> (i32, i32) {
    %c0_i32 = arith.constant 0 : i32
    %c0_i32_0 = arith.constant 0 : i32
    %c0_i32_1 = arith.constant 0 : i32
    return %c0_i32, %c0_i32_0 : i32, i32
  }
  func.func @transform_3(%arg0: i32) -> (i32, i32) {
    %c0_i32 = arith.constant 0 : i32
    %c0_i32_0 = arith.constant 0 : i32
    %c0_i32_1 = arith.constant 0 : i32
    return %c0_i32, %c0_i32_0 : i32, i32
  }
  func.func @transform_4(%arg0: i32) -> (i32, i32) {
    %c0_i32 = arith.constant 0 : i32
    %c0_i32_0 = arith.constant 0 : i32
    %c0_i32_1 = arith.constant 0 : i32
    return %c0_i32, %c0_i32_0 : i32, i32
  }
  func.func @transform_5(%arg0: i32) -> (i32, i32) {
    %c0_i32 = arith.constant 0 : i32
    %c0_i32_0 = arith.constant 0 : i32
    %c0_i32_1 = arith.constant 0 : i32
    return %c0_i32, %c0_i32_0 : i32, i32
  }
  func.func @transform_6(%arg0: i32) -> (i32, i32) {
    %c0_i32 = arith.constant 0 : i32
    %c0_i32_0 = arith.constant 0 : i32
    %c0_i32_1 = arith.constant 0 : i32
    return %c0_i32, %c0_i32_0 : i32, i32
  }
  func.func @transform_7(%arg0: i32) -> (i32, i32) {
    %c0_i32 = arith.constant 0 : i32
    %c0_i32_0 = arith.constant 0 : i32
    %c0_i32_1 = arith.constant 0 : i32
    return %c0_i32, %c0_i32_0 : i32, i32
  }
  func.func @transform_8(%arg0: i32) -> (i32, i32) {
    %c0_i32 = arith.constant 0 : i32
    %c0_i32_0 = arith.constant 0 : i32
    %c0_i32_1 = arith.constant 0 : i32
    return %c0_i32, %c0_i32_0 : i32, i32
  }
  func.func @transform_9(%arg0: i32) -> (i32, i32, i32) {
    %c0_i32 = arith.constant 0 : i32
    %c0_i32_0 = arith.constant 0 : i32
    %c0_i32_1 = arith.constant 0 : i32
    return %arg0, %c0_i32, %c0_i32_0 : i32, i32, i32
  }
}

</mosaic_0001>

<bundles_post_ra>
// kernel: tpu_custom_call.1
= control target key start
LH: loop header
LB: loop body
LE: loop exit
PB: predicated region body
PF: predicated region fallthrough
CT: control target
= control target key end

     0   :  { %s2112_s0 = inlined_call_operand.hbm [shape: f32[2,4,256], index: 0, kind: input, shape index: {}]   ;;  %s2113_s1 = inlined_call_operand.hbm [shape: f32[4,9], index: 1, kind: input, shape index: {}]   ;;  %s2114_s2 = inlined_call_operand.hbm [shape: f32[4,1], index: 2, kind: input, shape index: {}]   ;;  %s2115_s3 = inlined_call_operand.hbm [shape: f32[4,1], index: 3, kind: input, shape index: {}]   ;;  %s2116_s4 = inlined_call_operand.<no memory space> [shape: f32[1,1], index: 4, kind: input, shape index: {}]   ;;  %s2117_s5 = inlined_call_operand.hbm [shape: f32[4,1], index: 5, kind: input, shape index: {}]   ;;  %s2118_s6 = inlined_call_operand.hbm [shape: f32[4,1], index: 6, kind: input, shape index: {}]   ;;  %s2119_s7 = inlined_call_operand.hbm [shape: f32[4,4], index: 7, kind: input, shape index: {}]   ;;  %s2120_s8 = inlined_call_operand.hbm [shape: f32[4,1], index: 8, kind: input, shape index: {}]   ;;  %s2121_s9 = inlined_call_operand.hbm [shape: f32[2,4,256], index: 9, kind: output, shape index: {}]  }
   0x1   :  { %v14_v0 = vstv %s2116_s4 }
   0x2   :  { %15 = vst [vmem:[#allocation2] sm:$0x1] %v14_v0 }
   0x3   :  { %16 = vsyncpa [#allocation4], 0 }
   0x4   :  { %18 = vsyncpa [#allocation4 + $0x1], 0 }
   0x5   :  { %19 = vsyncpa [#allocation7], 0 }
   0x6   :  { %20 = vsyncpa [#allocation10], 0 }
   0x7   :  { %21 = vsyncpa [#allocation13], 0 }
   0x8   :  { %22 = vsyncpa [#allocation16], 0 }
   0x9   :  { %23 = vsyncpa [#allocation5], 0 }
   0xa   :  { %25 = vsyncpa [#allocation5 + $0x1], 0  ;;  %s1604_s11 = smov 0   ;;  %s1606_s12 = smov 0  }
   0xb   :  { %s1608_s13 = smov 0   ;;  %s1610_s14 = smov 0  }
   0xc LB: > { %s1524_s4 = smov [#allocation6]   ;;  %s1625_s16 = sadd.s32 4294967295, %s1522_s14   ;;  %s1522_s14 = sphi %s1610_s14, %s2162_s14   ;;  %s1518_s13 = sphi %s1608_s13, %s2161_s13   ;;  %s1514_s12 = sphi %s1606_s12, %s2160_s12   ;;  %s1510_s11 = sphi %s1604_s11, %s2159_s11  }
   0xd   : > { %s269_s15 = sshll.u32 %s1524_s4, 4  ;;  %p1022_p0 = scmp.ge.s32.totalorder %s1522_s14, 1  ;;  %s1630_s15 = int_to_ptr.vmem [resolvable:$true] %s269_s15 }
   0xe   : > { %p2122_p1 = scmp.eq.s32.totalorder %s1625_s16, 0  ;;  %p256_p2 = scmp.lt.s32.totalorder %s1522_s14, 3 }
   0xf   : > { %s1525_s18 = smov [#allocation9]   ;;  %s1526_s20 = smov [#allocation12]  }
  0x10   : > { %p1632_p3 = pnand %p1022_p0, %p256_p2  ;;  %s291_s19 = sshll.u32 %s1525_s18, 4  ;;  %s1639_s19 = int_to_ptr.vmem [resolvable:$true] %s291_s19 }
  0x11   : > { %s316_s21 = sshll.u32 %s1526_s20, 4  ;;  %s1527_s23 = smov [#allocation8]   ;;  %s1647_s21 = int_to_ptr.vmem [resolvable:$true] %s316_s21 }
  0x12   : > { %s2125_s17 = scalar_select %p1632_p3, 1, 0 }
  0x13   : > { %p1083_p5 = pneg %p1632_p3  ;;  %s1649_s24 = sshll.u32 %s1527_s23, 4  ;;  %s281_s24 = int_to_ptr.vmem [resolvable:$true] %s1649_s24 }
  0x14   : > { %s1214_s27 = scalar_lea.hbm %s2113_s1, 64 }
  0x15   : > { %p1643_p6 = pnand %p1083_p5, %p2122_p1  ;;  %p1215_p7 = scmp.ne.s32.totalorder %s2113_s1, %s1214_s27 }
  0x16   : > { %p1221_p11 = scmp.lt.u32.totalorder %s1214_s27, %s2113_s1 }
  0x17   : > { %p1659_p8 = pneg %p1643_p6 }
  0x19   : > { %p1217_p9 = pnand %p1659_p8, %p1215_p7 }
  0x1b   : > { %p1218_p10 = pneg %p1217_p9 }
  0x1d   : > { %p1223_p12 = pnand %p1221_p11, %p1218_p10 }
  0x1f   : > { %1226 = shalt.err (!%p1223_p12)
}
  0x20   : > { %s1227_s18 = scalar_lea.vmem %s1630_s15, 64  ;;  %p1235_p5 = scmp.lt.s32.totalorder %s1630_s15, %s1630_s15 }
  0x21   : > { %p1228_p13 = scmp.ne.s32.totalorder %s1630_s15, %s1227_s18  ;;  %p1236_p4 = scmp.lt.s32.totalorder %s1227_s18, %s1227_s18 }
  0x23   : > { %p1230_p0 = pnand %p1228_p13, %p1659_p8  ;;  %p1237_p7 = por %p1236_p4, %p1235_p5 }
  0x25   : > { %p1231_p2 = pneg %p1230_p0 }
  0x27   : > { %p1238_p9 = pnand %p1237_p7, %p1231_p2 }
  0x29   : > { %1241 = shalt.err (!%p1238_p9)
}
  0x2a   : > { %1086 = dma.hbm_to_vmem [thread:$0]  (!%p1643_p6), %s2113_s1, 64, %s1630_s15, [#allocation7]  }
  0x2b   : > { %s1242_s27 = scalar_lea.hbm %s2115_s3, 64 }
  0x2c   : > { %p1243_p10 = scmp.ne.s32.totalorder %s2115_s3, %s1242_s27  ;;  %p1249_p12 = scmp.lt.u32.totalorder %s1242_s27, %s2115_s3 }
  0x2e   : > { %p1245_p4 = pnand %p1243_p10, %p1659_p8 }
  0x30   : > { %p1246_p11 = pneg %p1245_p4 }
  0x32   : > { %p1251_p13 = pnand %p1249_p12, %p1246_p11 }
  0x34   : > { %1254 = shalt.err (!%p1251_p13)
}
  0x35   : > { %s1255_s15 = scalar_lea.vmem %s1639_s19, 64  ;;  %p1263_p7 = scmp.lt.s32.totalorder %s1639_s19, %s1639_s19 }
  0x36   : > { %p1256_p0 = scmp.ne.s32.totalorder %s1639_s19, %s1255_s15  ;;  %p1264_p9 = scmp.lt.s32.totalorder %s1255_s15, %s1255_s15 }
  0x38   : > { %p1258_p2 = pnand %p1256_p0, %p1659_p8  ;;  %p1265_p10 = por %p1264_p9, %p1263_p7 }
  0x3a   : > { %p1259_p5 = pneg %p1258_p2 }
  0x3c   : > { %p1266_p4 = pnand %p1265_p10, %p1259_p5 }
  0x3e   : > { %1269 = shalt.err (!%p1266_p4)
}
  0x3f   : > { %1092 = dma.hbm_to_vmem [thread:$0]  (!%p1643_p6), %s2115_s3, 64, %s1639_s19, [#allocation10]  }
  0x40   : > { %s1270_s26 = scalar_lea.hbm %s2118_s6, 64 }
  0x41   : > { %p1271_p11 = scmp.ne.s32.totalorder %s2118_s6, %s1270_s26  ;;  %p1277_p0 = scmp.lt.u32.totalorder %s1270_s26, %s2118_s6 }
  0x43   : > { %p1273_p12 = pnand %p1271_p11, %p1659_p8 }
  0x45   : > { %p1274_p13 = pneg %p1273_p12 }
  0x47   : > { %p1279_p2 = pnand %p1277_p0, %p1274_p13 }
  0x49   : > { %1282 = shalt.err (!%p1279_p2)
}
  0x4a   : > { %s1283_s19 = scalar_lea.vmem %s1647_s21, 64  ;;  %p1291_p10 = scmp.lt.s32.totalorder %s1647_s21, %s1647_s21 }
  0x4b   : > { %p1284_p5 = scmp.ne.s32.totalorder %s1647_s21, %s1283_s19  ;;  %p1292_p4 = scmp.lt.s32.totalorder %s1283_s19, %s1283_s19 }
  0x4d   : > { %p1286_p7 = pnand %p1284_p5, %p1659_p8  ;;  %p1293_p11 = por %p1292_p4, %p1291_p10 }
  0x4f   : > { %p1287_p9 = pneg %p1286_p7 }
  0x51   : > { %p1294_p12 = pnand %p1293_p11, %p1287_p9 }
  0x53   : > { %1297 = shalt.err (!%p1294_p12)
}
  0x54   : > { %1098 = dma.hbm_to_vmem [thread:$0]  (!%p1643_p6), %s2118_s6, 64, %s1647_s21, [#allocation13]  }
  0x55   : > { %s1528_s18 = smov [#allocation11]   ;;  %s1298_s26 = scalar_lea.hbm %s2114_s2, 64 }
  0x56   : > { %s305_s20 = sshll.u32 %s1528_s18, 4  ;;  %p1299_p13 = scmp.ne.s32.totalorder %s2114_s2, %s1298_s26  ;;  %s306_s20 = int_to_ptr.vmem [resolvable:$true] %s305_s20 }
  0x57   : > { %p1305_p5 = scmp.lt.u32.totalorder %s1298_s26, %s2114_s2 }
  0x58   : > { %p1301_p0 = pnand %p1299_p13, %p1659_p8 }
  0x5a   : > { %p1302_p2 = pneg %p1301_p0 }
  0x5c   : > { %p1307_p7 = pnand %p1305_p5, %p1302_p2 }
  0x5e   : > { %1310 = shalt.err (!%p1307_p7)
}
  0x5f   : > { %s1311_s21 = scalar_lea.vmem %s281_s24, 64  ;;  %p1319_p11 = scmp.lt.s32.totalorder %s281_s24, %s281_s24 }
  0x60   : > { %p1312_p9 = scmp.ne.s32.totalorder %s281_s24, %s1311_s21  ;;  %p1320_p12 = scmp.lt.s32.totalorder %s1311_s21, %s1311_s21 }
  0x62   : > { %p1314_p10 = pnand %p1312_p9, %p1659_p8  ;;  %p1321_p1 = por %p1320_p12, %p1319_p11 }
  0x64   : > { %p1315_p4 = pneg %p1314_p10 }
  0x66   : > { %p1322_p3 = pnand %p1321_p1, %p1315_p4 }
  0x68   : > { %1325 = shalt.err (!%p1322_p3)
}
  0x69   : > { %1089 = dma.hbm_to_vmem [thread:$0]  (!%p1643_p6), %s2114_s2, 64, %s281_s24, [#allocation7]  }
  0x6a   : > { %s1326_s23 = scalar_lea.hbm %s2117_s5, 64 }
  0x6b   : > { %p1327_p13 = scmp.ne.s32.totalorder %s2117_s5, %s1326_s23  ;;  %p1333_p3 = scmp.lt.u32.totalorder %s1326_s23, %s2117_s5 }
  0x6d   : > { %p1329_p0 = pnand %p1327_p13, %p1659_p8 }
  0x6f   : > { %p1330_p1 = pneg %p1329_p0 }
  0x71   : > { %p1335_p2 = pnand %p1333_p3, %p1330_p1 }
  0x73   : > { %1338 = shalt.err (!%p1335_p2)
}
  0x74   : > { %s1339_s29 = scalar_lea.vmem %s306_s20, 64  ;;  %p1347_p10 = scmp.lt.s32.totalorder %s306_s20, %s306_s20 }
  0x75   : > { %p1340_p5 = scmp.ne.s32.totalorder %s306_s20, %s1339_s29  ;;  %p1348_p4 = scmp.lt.s32.totalorder %s1339_s29, %s1339_s29 }
  0x77   : > { %p1342_p7 = pnand %p1340_p5, %p1659_p8  ;;  %p1349_p11 = por %p1348_p4, %p1347_p10 }
  0x79   : > { %p1343_p9 = pneg %p1342_p7 }
  0x7b   : > { %p1350_p12 = pnand %p1349_p11, %p1343_p9 }
  0x7d   : > { %1353 = shalt.err (!%p1350_p12)
}
  0x7e   : > { %1095 = dma.hbm_to_vmem [thread:$0]  (!%p1643_p6), %s2117_s5, 64, %s306_s20, [#allocation10]  }
  0x7f   : > { %s1529_s21 = smov [#allocation14]   ;;  %s1530_s4 = smov [#allocation15]  }
  0x80   : > { %s327_s19 = sshll.u32 %s1529_s21, 4  ;;  %s338_s15 = sshll.u32 %s1530_s4, 4  ;;  %s328_s19 = int_to_ptr.vmem [resolvable:$true] %s327_s19  ;;  %s339_s15 = int_to_ptr.vmem [resolvable:$true] %s338_s15 }
  0x81   : > { %s1354_s25 = scalar_lea.hbm %s2119_s7, 64 }
  0x82   : > { %p1355_p13 = scmp.ne.s32.totalorder %s2119_s7, %s1354_s25  ;;  %p1361_p3 = scmp.lt.u32.totalorder %s1354_s25, %s2119_s7 }
  0x84   : > { %p1357_p0 = pnand %p1355_p13, %p1659_p8 }
  0x86   : > { %p1358_p1 = pneg %p1357_p0 }
  0x88   : > { %p1363_p2 = pnand %p1361_p3, %p1358_p1 }
  0x8a   : > { %1366 = shalt.err (!%p1363_p2)
}
  0x8b   : > { %s1367_s20 = scalar_lea.vmem %s328_s19, 64  ;;  %p1375_p10 = scmp.lt.s32.totalorder %s328_s19, %s328_s19 }
  0x8c   : > { %p1368_p5 = scmp.ne.s32.totalorder %s328_s19, %s1367_s20  ;;  %p1376_p4 = scmp.lt.s32.totalorder %s1367_s20, %s1367_s20 }
  0x8e   : > { %p1370_p7 = pnand %p1368_p5, %p1659_p8  ;;  %p1377_p11 = por %p1376_p4, %p1375_p10 }
  0x90   : > { %p1371_p9 = pneg %p1370_p7 }
  0x92   : > { %p1378_p12 = pnand %p1377_p11, %p1371_p9 }
  0x94   : > { %1381 = shalt.err (!%p1378_p12)
}
  0x95   : > { %1101 = dma.hbm_to_vmem [thread:$0]  (!%p1643_p6), %s2119_s7, 64, %s328_s19, [#allocation13]  }
  0x96   : > { %s1382_s18 = scalar_lea.hbm %s2120_s8, 64 }
  0x97   : > { %p1383_p13 = scmp.ne.s32.totalorder %s2120_s8, %s1382_s18  ;;  %p1389_p3 = scmp.lt.u32.totalorder %s1382_s18, %s2120_s8 }
  0x99   : > { %p1385_p0 = pnand %p1383_p13, %p1659_p8 }
  0x9b   : > { %p1386_p1 = pneg %p1385_p0 }
  0x9d   : > { %p1391_p2 = pnand %p1389_p3, %p1386_p1 }
  0x9f   : > { %1394 = shalt.err (!%p1391_p2)
}
  0xa0   : > { %s1395_s28 = scalar_lea.vmem %s339_s15, 64  ;;  %p1403_p10 = scmp.lt.s32.totalorder %s339_s15, %s339_s15 }
  0xa1   : > { %p1396_p5 = scmp.ne.s32.totalorder %s339_s15, %s1395_s28  ;;  %p1404_p4 = scmp.lt.s32.totalorder %s1395_s28, %s1395_s28 }
  0xa3   : > { %p1398_p7 = pnand %p1396_p5, %p1659_p8  ;;  %p1405_p11 = por %p1404_p4, %p1403_p10 }
  0xa5   : > { %p1399_p9 = pneg %p1398_p7 }
  0xa7   : > { %p1406_p12 = pnand %p1405_p11, %p1399_p9 }
  0xa9   : > { %1409 = shalt.err (!%p1406_p12)
}
  0xaa   : > { %1104 = dma.hbm_to_vmem [thread:$0]  (!%p1643_p6), %s2120_s8, 64, %s339_s15, [#allocation16]  }
  0xab   : > { %s1021_s30 = sadd.s32 4294967294, %s1522_s14   ;;  %s1801_s22 = sadd.s32 1, %s1522_s14  }
  0xac   : > { %s38_s20 = sadd.s32 1, %s1518_s13  ;;  %s35_s24 = ssub.s32 %s1522_s14, %s1801_s22 }
  0xad   : > { %p45_p8 = scmp.ne.s32.totalorder %s1518_s13, %s1514_s12  ;;  %p36_p13 = scmp.eq.s32.totalorder %s35_s24, 0 }
  0xae   : > { %p46_p0 = scmp.eq.s32.totalorder %s1522_s14, 0  ;;  %p51_p1 = scmp.ne.s32.totalorder %s1514_s12, %s1510_s11 }
  0xaf   : > { %p243_p3 = scmp.eq.s32.totalorder %s1625_s16, 1  ;;  %p2128_p5 = scmp.eq.s32.totalorder %s1625_s16, 0 }
  0xb0   : > { %s1813_s10 = scalar_select %p36_p13, %s1518_s13, %s38_s20  }
  0xb1   : > { %p47_p2 = por %p46_p0, %p45_p8  ;;  %p1817_p7 = por %p2128_p5, %p51_p1 }
  0xb2   : > { %p1821_p6 = por %p243_p3, %p45_p8  ;;  %p249_p9 = scmp.eq.s32.totalorder %s1021_s30, 1 }
  0xb3   : > { %p1120_p10 = scmp.lt.s32.totalorder %s1522_s14, 2  ;;  %s349_s4 = sand.u32 1, %s1518_s13  }
  0xb4   : > { %s2130_s15 = scalar_select %p1821_p6, 1, 0 }
  0xb5   : > { %p1827_p4 = por %p249_p9, %p51_p1  ;;  %s1031_s23 = sshll.u32 %s349_s4, 3 }
  0xb6   : > { %s1049_s25 = sshll.u32 %s1522_s14, 7  ;;  %s353_s19 = scalar_lea.vmem [#allocation3], %s1031_s23 }
  0xb7   : > { %s2131_s18 = scalar_select %p1827_p4, 1, 0 }
  0xb8   : > { %s1835_s28 = scalar_lea.hbm %s2112_s0, %s1049_s25  ;;  %s361_s29 = sshll.u32 %s353_s19, 4  ;;  %s1841_s29 = int_to_ptr.vmem [resolvable:$true] %s361_s29 }
  0xb9   : > { %p1837_p11 = pnand %p1120_p10, %p47_p2  ;;  %s350_s20 = scalar_lea.sflag [#allocation4], %s349_s4 }
  0xba   : > { %s1410_s24 = scalar_lea.hbm %s1835_s28, 128  ;;  %s1415_s26 = scalar_lea.hbm %s2112_s0, 256 }
  0xbb   : > { %p1411_p12 = scmp.ne.s32.totalorder %s1835_s28, %s1410_s24  ;;  %p1412_p8 = pneg %p1837_p11 }
  0xbc   : > { %p1416_p1 = scmp.lt.u32.totalorder %s1835_s28, %s2112_s0  ;;  %p1417_p3 = scmp.lt.u32.totalorder %s1415_s26, %s1410_s24 }
  0xbd   : > { %p1413_p13 = pnand %p1412_p8, %p1411_p12  ;;  %p1419_p5 = scmp.lt.u32.totalorder %s1410_s24, %s1835_s28 }
  0xbe   : > { %p1418_p2 = por %p1417_p3, %p1416_p1 }
  0xbf   : > { %p1414_p0 = pneg %p1413_p13 }
  0xc0   : > { %p1420_p9 = por %p1419_p5, %p1418_p2 }
  0xc2   : > { %p1421_p10 = pnand %p1420_p9, %p1414_p0 }
  0xc4   : > { %1424 = shalt.err (!%p1421_p10)
}
  0xc5   : > { %s1425_s4 = scalar_lea.vmem %s1841_s29, 128  ;;  %s1531_s25 = smov [#allocation3]  }
  0xc6   : > { %p1426_p12 = scmp.ne.s32.totalorder %s1841_s29, %s1425_s4  ;;  %s1430_s23 = sshll.u32 %s1531_s25, 4  ;;  %s1431_s23 = int_to_ptr.vmem [resolvable:$false] %s1430_s23 }
  0xc7   : > { %s1432_s27 = scalar_lea.vmem %s1431_s23, 256  ;;  %p1433_p6 = scmp.lt.s32.totalorder %s1841_s29, %s1431_s23 }
  0xc8   : > { %p1428_p13 = pnand %p1426_p12, %p1412_p8  ;;  %p1434_p1 = scmp.lt.s32.totalorder %s1432_s27, %s1425_s4 }
  0xca   : > { %p1429_p4 = pneg %p1428_p13  ;;  %p1435_p3 = por %p1434_p1, %p1433_p6 }
  0xcc   : > { %p1436_p2 = pnand %p1435_p3, %p1429_p4 }
  0xce   : > { %1439 = shalt.err (!%p1436_p2)
}
  0xcf   : > { %1108 = dma.hbm_to_vmem [thread:$0]  (!%p1837_p11), %s1835_s28, 128, %s1841_s29, %s350_s20  }
  0xd0   : > { %p2133_p0 = scmp.ne.s32.totalorder %s2125_s17, 0 }
  0xd1   : > { %s1871_s24 = sand.u32 (!%p2133_p0), 1, %s1514_s12  }
  0xd2   : > { %370 = sbr.rel (%p2133_p0) target bundleno = 860 (0x35c), region = 56  ;;  %s1035_s26 = sshll.u32 (!%p2133_p0), %s1871_s24, 3 }
  0xd3   : > { %s373_s19 = scalar_lea.sflag (!%p2133_p0), [#allocation4], %s1871_s24  ;;  %s376_s4 = scalar_lea.vmem (!%p2133_p0), [#allocation3], %s1035_s26 }
  0xd9   : > { %1485 = dma.done.wait (%p1817_p7), %s373_s19, 128  }
  0xda   : > { %1487 = vsyncadd (%p1817_p7), %s373_s19, 4294967168  ;;  %p2134_p6 = scmp.eq.s32.totalorder %s1625_s16, 0 }
  0xdc   : > { %1489 = dma.done.wait (%p2134_p6), [#allocation7], 128   ;;  %p2135_p4 = pmov %p2134_p6 }
  0xde   : > { %1491 = vsyncadd (%p2135_p4), [#allocation7], 4294967168  ;;  %p2136_p11 = pmov %p2135_p4 }
  0xdf   : > { %p2137_p8 = pmov %p2135_p4 }
  0xe0   : > { %1493 = dma.done.wait (%p2136_p11), [#allocation10], 128  }
  0xe1   : > { %1495 = vsyncadd (%p2137_p8), [#allocation10], 4294967168  ;;  %p2138_p5 = pmov %p2135_p4 }
  0xe2   : > { %p2139_p9 = pmov %p2135_p4 }
  0xe3   : > { %1497 = dma.done.wait (%p2138_p5), [#allocation13], 128  }
  0xe4   : > { %1499 = vsyncadd (%p2139_p9), [#allocation13], 4294967168  ;;  %p2140_p7 = pmov %p2135_p4 }
  0xe5   : > { %p2141_p10 = pmov %p2135_p4 }
  0xe6   : > { %1501 = dma.done.wait (%p2140_p7), [#allocation16], 64  }
  0xe7   : > { %1503 = vsyncadd (%p2141_p10), [#allocation16], 4294967232  ;;  %v1532_v1 = vmov 1   ;;  %v1533_v2 = vmov 4   ;;  %v440_v3 = vld [vmem:[#allocation6] sm:$0xf]  ;;  %v441_v23 = vlaneseq }
  0xe8   : > { %1188 = vset.pattern.permute.xlu1 %v1532_v1  ;;  %1186 = vset.pattern.permute.xlu0 %v1533_v2  ;;  %v1534_v4 = vmov 2   ;;  %v1535_v5 = vmov 0   ;;  %v1900_v6 = vld [vmem:[%s376_s4] sm:$0xff]  ;;  %s1536_s17 = smov 17   ;;  %v1537_v8 = vmov 3   ;;  %v1538_v9 = vmov 5  }
  0xe9   : > { %510 = vperm.xlu1 %1188, %v440_v3   ;;  %456 = vperm.xlu0 %1186, %v440_v3   ;;  %v1904_v7 = vcombine.high %v1900_v6, %v1900_v6  ;;  %s1539_s21 = smov 16   ;;  %s1540_s28 = smov 15   ;;  %v1541_v10 = vmov 6   ;;  %v1542_v11 = vmov 7   ;;  %v1544_v12 = vmov 8  }
  0xea   : > { %s1543_s29 = smov 1   ;;  %s1545_s30 = smov 112   ;;  %v670_v13 = vld [vmem:[#allocation8] sm:$0xf]  ;;  %v1931_v26 = vand.u32 127, %v441_v23  ;;  %v1939_v34 = vshrl.u32 %v441_v23, 7 }
  0xeb   : > { %s1546_s20 = smov 127   ;;  %s1547_s25 = smov 113   ;;  %v1549_v30 = vmov 839922192  }
  0xec   : > { %s1548_s23 = smov 111   ;;  %v1936_v29 = vadd.s32 128, %v1931_v26  ;;  %v459_v31 = vunpack.c.l.s4 %v1549_v30  ;;  %v444_v32 = vand.u32 15, %v1931_v26  ;;  %vm446_vm0 = vcmp.ge.s32.totalorder %v1931_v26, 16  ;;  %s1050_s27 = sshll.u32 %s1625_s16, 7 }
  0xed   : > { %1189 = vset.pattern.permute.xlu1 %v1534_v4  ;;  %1187 = vset.pattern.permute.xlu0 %v1535_v5  ;;  %vm474_vm2 = vcmp.lt.s32.totalorder %v1931_v26, 17  ;;  %vm500_vm5 = vcmp.lt.s32.totalorder %v1931_v26, 16  ;;  %vm524_vm7 = vcmp.lt.s32.totalorder %v1931_v26, 15  ;;  %vm550_vm9 = vcmp.lt.s32.totalorder %v1931_v26, 1  ;;  %s438_s19 = scalar_lea.vmem [#allocation17], %s1035_s26  ;;  %s870_s16 = scalar_lea.sflag [#allocation5], %s1871_s24 }
  0xee   : > { %536 = vperm.xlu1 %1189, %v440_v3   ;;  %486 = vperm.xlu0 %1187, %v440_v3   ;;  %v445_v35 = vand.u32 15, %v1936_v29  ;;  %v460_v37 = vunpack.c.0.s8 %v459_v31  ;;  %vm1945_vm1 = vcmp.ge.s32.totalorder %v444_v32, 1  ;;  %vm1966_vm6 = vcmp.le.s32.totalorder %v444_v32, 14  ;;  %s884_s4 = sshll.u32 %s438_s19, 4  ;;  %p2156_p13 = scmp.ne.s32.totalorder %s2130_s15, 0  ;;  %s2070_s4 = int_to_ptr.vmem [resolvable:$true] %s884_s4 }
  0xef   : > { %vm1958_vm4 = vmand %vm446_vm0, %vm1945_vm1  ;;  %vm574_vm11 = vcmp.lt.s32.totalorder %v1931_v26, 127  ;;  %vm449_vm12 = vcmp.lt.s32.totalorder %v1936_v29, 240  ;;  %vm598_vm13 = vcmp.lt.s32.totalorder %v1931_v26, 113  ;;  %vm624_vm15 = vcmp.lt.s32.totalorder %v1931_v26, 112  ;;  %s1550_s26 = smov [#allocation17]  }
  0xf0   : > { %vm1950_vm3 = vcmp.ge.s32.totalorder %v445_v35, 1  ;;  %v1964_v44 = vsub.s32 %v460_v37, %v1939_v34  ;;  %vm1977_vm8 = vcmp.le.s32.totalorder %v445_v35, 14  ;;  %vm1988_vm10 = vmand %vm446_vm0, %vm1966_vm6 }
  0xf1   : > { %vm2018_vm14 = vmand %vm449_vm12, %vm1950_vm3 }
  0xf2   : > { %470 = vrot.lane.b32.xlu1 %v1900_v6, %s1536_s17  ;;  %472 = vrot.lane.b32.xlu0 %v1904_v7, %s1536_s17 }
  0xf3   : > { %1190 = vset.pattern.permute.xlu1 %v1537_v8  ;;  %1191 = vset.pattern.permute.xlu0 %v1538_v9 }
  0xf6   : > { %560 = vperm.xlu1 %1190, %v440_v3   ;;  %496 = vrot.lane.b32.xlu0 %v1900_v6, %s1539_s21 }
  0xfa   : > { %498 = vrot.lane.b32.xlu1 %v1904_v7, %s1539_s21  ;;  %584 = vperm.xlu0 %1191, %v440_v3  }
  0xfb   : > { %1196 = vset.pattern.permute.xlu1 %v1535_v5 }
  0xfe   : > { %520 = vrot.lane.b32.xlu1 %v1900_v6, %s1540_s28  ;;  %1192 = vset.pattern.permute.xlu0 %v1541_v10 }
  0xff   : > { %610 = vperm.xlu0 %1192, %v440_v3  }
 0x102   : > { %522 = vrot.lane.b32.xlu1 %v1904_v7, %s1540_s28  ;;  %s2068_s28 = scalar_lea.hbm %s2121_s9, %s1050_s27 }
 0x103   : > { %1193 = vset.pattern.permute.xlu0 %v1542_v11 }
 0x104   : > { %634 = vperm.xlu0 %1193, %v440_v3  }
 0x106   : > { %546 = vrot.lane.b32.xlu1 %v1900_v6, %s1543_s29 }
 0x108   : > { %1194 = vset.pattern.permute.xlu0 %v1544_v12 }
 0x109   : > { %660 = vperm.xlu0 %1194, %v440_v3  }
 0x10a   : > { %548 = vrot.lane.b32.xlu1 %v1904_v7, %s1543_s29  ;;  %s1440_s29 = scalar_lea.vmem %s2070_s4, 128 }
 0x10b   : > { %p1441_p12 = scmp.ne.s32.totalorder %s2070_s4, %s1440_s29 }
 0x10d   : > { %620 = vrot.lane.b32.xlu0 %v1900_v6, %s1545_s30  ;;  %p1442_p1 = pnand %p1441_p12, %p2156_p13 }
 0x10e   : > { %570 = vrot.lane.b32.xlu1 %v1900_v6, %s1546_s20  ;;  %1195 = vset.pattern.permute.xlu0 %v1535_v5 }
 0x10f   : > { %p1443_p3 = pneg %p1442_p1 }
 0x111   : > { %673 = vperm.xlu0 %1195, %v670_v13  }
 0x112   : > { %572 = vrot.lane.b32.xlu1 %v1904_v7, %s1546_s20 }
 0x116   : > { %594 = vrot.lane.b32.xlu1 %v1900_v6, %s1547_s25 }
 0x11a   : > { %596 = vrot.lane.b32.xlu1 %v1904_v7, %s1547_s25 }
 0x11e   : > { %622 = vrot.lane.b32.xlu1 %v1904_v7, %s1545_s30  ;;  %s1444_s30 = sshll.u32 %s1550_s26, 4  ;;  %s1445_s30 = int_to_ptr.vmem [resolvable:$false] %s1444_s30 }
 0x11f   : > { %s1446_s20 = scalar_lea.vmem %s1445_s30, 256  ;;  %p1447_p2 = scmp.lt.s32.totalorder %s2070_s4, %s1445_s30 }
 0x120   : > { %p1448_p0 = scmp.lt.s32.totalorder %s1446_s20, %s1440_s29 }
 0x122   : > { %644 = vrot.lane.b32.xlu1 %v1900_v6, %s1548_s23  ;;  %p1449_p6 = por %p1448_p0, %p1447_p2 }
 0x124   : > { %p1450_p4 = pnand %p1449_p6, %p1443_p3 }
 0x126   : > { %646 = vrot.lane.b32.xlu1 %v1904_v7, %s1548_s23 }
 0x168   : > { %v511_v14 = vpop.permute.xlu1 %510  ;;  %v1927_v16 = vpop.permute.xlu0 %456 }
 0x169   : > { %v464_v52 = vrot.slane %v1927_v16, %v1964_v44 }
 0x16b   : > { %v466_v12 = vmul.f32 %v464_v52, %v1900_v6 }
 0x16d   : > { %v1925_v15 = vpop.permute.xlu1 %536  ;;  %v487_v19 = vpop.permute.xlu0 %486 }
 0x171   : > { %v471_v17 = vpop.permute.xlu1 %470  ;;  %v473_v21 = vpop.permute.xlu0 %472 }
 0x172   : > { %v475_v42 = vsel %vm474_vm2, %v471_v17, %v473_v21  ;;  %v476_v43 = vsel %vm474_vm2, %v473_v21, %v471_v17  ;;  %vm694_vm2 = vcmask 1043456  }
 0x173   : > { %v483_v48 = vsel %vm1958_vm4, %v476_v43, 0.0  ;;  %v484_v49 = vsel %vm1950_vm3, %v475_v42, 0.0 }
 0x174   : > { %v489_v56 = vmul.f32 %v487_v19, %v483_v48  ;;  %v490_v57 = vmul.f32 %v487_v19, %v484_v49 }
 0x175   : > { %v1929_v18 = vpop.permute.xlu1 %560  ;;  %v497_v24 = vpop.permute.xlu0 %496 }
 0x176   : > { %v493_v13 = vcombine.low %v489_v56, %v490_v57 }
 0x178   : > { %v495_v31 = vadd.f32 %v493_v13, %v466_v12 }
 0x179   : > { %v499_v20 = vpop.permute.xlu1 %498  ;;  %v1933_v28 = vpop.permute.xlu0 %584 }
 0x17a   : > { %v502_v50 = vsel %vm500_vm5, %v499_v20, %v497_v24  ;;  %v501_v58 = vsel %vm500_vm5, %v497_v24, %v499_v20 }
 0x17b   : > { %v507_v59 = vsel %vm446_vm0, %v502_v50, 0.0  ;;  %v514_v9 = vmul.f32 %v511_v14, %v501_v58  ;;  %vm648_vm0 = vcmp.lt.s32.totalorder %v1931_v26, 111 }
 0x17c   : > { %v513_v3 = vmul.f32 %v511_v14, %v507_v59 }
 0x17d   : > { %v521_v22 = vpop.permute.xlu1 %520 }
 0x17e   : > { %v1942_v36 = vpop.permute.xlu0 %610 }
 0x181   : > { %v523_v25 = vpop.permute.xlu1 %522 }
 0x182   : > { %v525_v54 = vsel %vm524_vm7, %v521_v22, %v523_v25  ;;  %v526_v55 = vsel %vm524_vm7, %v523_v25, %v521_v22 }
 0x183   : > { %v635_v47 = vpop.permute.xlu0 %634  ;;  %v533_v63 = vsel %vm1988_vm10, %v526_v55, 0.0  ;;  %v534_v0 = vsel %vm1977_vm8, %v525_v54, 0.0 }
 0x184   : > { %v539_v20 = vmul.f32 %v1925_v15, %v533_v63  ;;  %v540_v14 = vmul.f32 %v1925_v15, %v534_v0 }
 0x185   : > { %v547_v27 = vpop.permute.xlu1 %546 }
 0x188   : > { %v661_v2 = vpop.permute.xlu0 %660 }
 0x189   : > { %v549_v33 = vpop.permute.xlu1 %548 }
 0x18a   : > { %v551_v61 = vsel %vm550_vm9, %v547_v27, %v549_v33  ;;  %v552_v62 = vsel %vm550_vm9, %v549_v33, %v547_v27  ;;  %v517_v27 = vcombine.low %v513_v3, %v514_v9 }
 0x18b   : > { %v557_v16 = vsel %vm1945_vm1, %v552_v62, 0.0  ;;  %v558_v17 = vsel %vm1950_vm3, %v551_v61, 0.0  ;;  %vm704_vm3 = vcmask 3072  }
 0x18c   : > { %v563_v15 = vmul.f32 %v1929_v18, %v557_v16  ;;  %v564_v30 = vmul.f32 %v1929_v18, %v558_v17  ;;  %v621_v35 = vpop.permute.xlu0 %620  ;;  %v519_v18 = vadd.f32 %v517_v27, %v495_v31 }
 0x18d   : > { %v571_v39 = vpop.permute.xlu1 %570 }
 0x18e   : > { %v567_v48 = vcombine.low %v563_v15, %v564_v30 }
 0x190   : > { %v674_v63 = vpop.permute.xlu0 %673 }
 0x191   : > { %v573_v46 = vpop.permute.xlu1 %572  ;;  %v681_v51 = vrot.slane %v674_v63, %v1964_v44  ;;  %v808_v63 = vsub.s32 6, %v1939_v34 }
 0x192   : > { %v575_v10 = vsel %vm574_vm11, %v571_v39, %v573_v46  ;;  %v576_v11 = vsel %vm574_vm11, %v573_v46, %v571_v39  ;;  %v543_v39 = vcombine.low %v539_v20, %v540_v14 }
 0x193   : > { %v581_v24 = vsel %vm1966_vm6, %v575_v10, 0.0  ;;  %v582_v25 = vsel %vm1977_vm8, %v576_v11, 0.0 }
 0x194   : > { %v587_v40 = vmul.f32 %v1933_v28, %v581_v24  ;;  %v588_v41 = vmul.f32 %v1933_v28, %v582_v25  ;;  %v545_v52 = vadd.f32 %v543_v39, %v519_v18 }
 0x195   : > { %v595_v60 = vpop.permute.xlu1 %594 }
 0x196   : > { %v591_v53 = vcombine.low %v587_v40, %v588_v41  ;;  %v569_v56 = vadd.f32 %v567_v48, %v545_v52 }
 0x198   : > { %v593_v58 = vadd.f32 %v591_v53, %v569_v56 }
 0x199   : > { %v597_v19 = vpop.permute.xlu1 %596 }
 0x19a   : > { %v599_v22 = vsel %vm598_vm13, %v595_v60, %v597_v19  ;;  %v600_v23 = vsel %vm598_vm13, %v597_v19, %v595_v60 }
 0x19b   : > { %v607_v32 = vsel %vm1945_vm1, %v599_v22, 0.0  ;;  %v608_v33 = vsel %vm2018_vm14, %v600_v23, 0.0  ;;  %vm652_vm1 = vmand %vm449_vm12, %vm1977_vm8  ;;  %v702_v22 = vld [vmem:[#allocation9] sm:$0xf] }
 0x19c   : > { %v613_v38 = vmul.f32 %v1942_v36, %v607_v32  ;;  %v614_v49 = vmul.f32 %v1942_v36, %v608_v33 }
 0x19d   : > { %v623_v37 = vpop.permute.xlu1 %622 }
 0x19e   : > { %v626_v42 = vsel %vm624_vm15, %v623_v37, %v621_v35  ;;  %v625_v43 = vsel %vm624_vm15, %v621_v35, %v623_v37  ;;  %v617_v28 = vcombine.low %v613_v38, %v614_v49  ;;  %v712_v35 = vld [vmem:[#allocation2] sm:$0x1] }
 0x19f   : > { %v632_v46 = vsel %vm449_vm12, %v626_v42, 0.0  ;;  %v637_v54 = vmul.f32 %v635_v47, %v625_v43  ;;  %v721_v38 = vld [vmem:[#allocation11] sm:$0xf] }
 0x1a0   : > { %v638_v55 = vmul.f32 %v635_v47, %v632_v46  ;;  %v619_v47 = vadd.f32 %v617_v28, %v593_v58  ;;  %v724_v46 = vsub.s32 0, %v1939_v34  ;;  %v854_v58 = vld [vmem:[#allocation15] sm:$0xf] }
 0x1a1   : > { %v645_v50 = vpop.permute.xlu1 %644 }
 0x1a2   : > { %v641_v59 = vcombine.low %v637_v54, %v638_v55 }
 0x1a4   : > { %v643_v9 = vadd.f32 %v641_v59, %v619_v47 }
 0x1a5   : > { %v647_v57 = vpop.permute.xlu1 %646 }
 0x1a6   : > { %v649_v60 = vsel %vm648_vm0, %v645_v50, %v647_v57  ;;  %v650_v61 = vsel %vm648_vm0, %v647_v57, %v645_v50  ;;  %v728_v50 = vld [vmem:[#allocation12] sm:$0xf] }
 0x1a7   : > { %v657_v36 = vsel %vm1966_vm6, %v649_v60, 0.0  ;;  %v658_v62 = vsel %vm652_vm1, %v650_v61, 0.0 }
 0x1a8   : > { %v663_v0 = vmul.f32 %v661_v2, %v657_v36  ;;  %v664_v26 = vmul.f32 %v661_v2, %v658_v62  ;;  %v749_v2 = vld [vmem:[#allocation14] sm:$0xf]  ;;  %v757_v36 = vsub.s32 4, %v1939_v34  ;;  %v778_v62 = vsub.s32 1, %v1939_v34 }
 0x1a9   : > { %771 = vperm.xlu1 %1196, %v749_v2  }
 0x1aa   : > { %v667_v3 = vcombine.low %v663_v0, %v664_v26 }
 0x1ac   : > { %v669_v10 = vadd.f32 %v667_v3, %v643_v9 }
 0x1ae   : > { %v683_v29 = vadd.f32 %v681_v51, %v669_v10  ;;  %v834_v10 = vsub.s32 7, %v1939_v34 }
 0x1b0   : > { %v684_v11 = vsub.f32 0.0, %v683_v29 }
 0x1b2   : > { %v685_v12 = vmul.f32 1.442695, %v684_v11 }
 0x1b4   : > { %1202 = vpow2.f32 %v685_v12 }
 0x1be   : > { %v1203_v13 = vpop.eup %1202 }
 0x1bf   : > { %v687_v16 = vadd.f32 1.0, %v1203_v13 }
 0x1c1   : > { %1204 = vrcp.f32 %v687_v16 }
 0x1cb   : > { %v1205_v17 = vpop.eup %1204 }
 0x1cc   : > { %v690_v45 = vmul.f32 %v1205_v17, %v683_v29 }
 0x1ce   : > { %v692_v19 = vcombine.high %v690_v45, %v690_v45  ;;  %v695_v20 = vsel %vm694_vm2, %v690_v45, 0.0 }
 0x1d0   : > { %v696_v14 = vsel %vm694_vm2, %v692_v19, 0.0 }
 0x1d1   : > { %v697_v21 = vadd.f32 %v696_v14, %v695_v20 }
 0x1d3   : > { %698 = vadd.xlane.f32.xlu0 %v697_v21 }
 0x228   : > { %v772_v59 = vpop.permute.xlu1 %771 }
 0x260   : > { %v699_v23 = vpop.xlane.xlu0 %698 }
 0x261   : > { %v701_v24 = vmul.f32 0.00390625, %v699_v23 }
 0x263   : > { %v703_v25 = vmul.f32 %v702_v22, %v701_v24 }
 0x265   : > { %v705_v27 = vsel %vm704_vm3, %v703_v25, 0.0 }
 0x266   : > { %v706_v15 = vrot.slane %v705_v27, 4 }
 0x268   : > { %v707_v30 = vadd.f32 %v706_v15, %v705_v27 }
 0x26a   : > { %v708_v31 = vrot.slane %v707_v30, 2 }
 0x26c   : > { %v709_v32 = vadd.f32 %v708_v31, %v707_v30 }
 0x26e   : > { %v710_v33 = vrot.slane %v709_v32, 1 }
 0x270   : > { %v711_v37 = vadd.f32 %v710_v33, %v709_v32 }
 0x272   : > { %v713_v39 = vadd.f32 %v712_v35, %v711_v37 }
 0x274   : > { %v714_v40 = vsub.f32 0.0, %v713_v39 }
 0x276   : > { %v715_v41 = vmul.f32 1.442695, %v714_v40 }
 0x278   : > { %1206 = vpow2.f32 %v715_v41 }
 0x282   : > { %v1207_v42 = vpop.eup %1206 }
 0x283   : > { %v717_v43 = vadd.f32 1.0, %v1207_v42 }
 0x285   : > { %1208 = vrcp.f32 %v717_v43 }
 0x28f   : > { %v1209_v18 = vpop.eup %1208 }
 0x290   : > { %v720_v48 = vmul.f32 %v1209_v18, %v713_v39 }
 0x292   : > { %v725_v49 = vrot.slane %v720_v48, %v724_v46 }
 0x294   : > { %v726_v52 = vmul.f32 %v725_v49, %v721_v38 }
 0x296   : > { %v729_v53 = vadd.f32 %v728_v50, %v726_v52 }
 0x298   : > { %v730_v54 = vsub.f32 0.0, %v729_v53 }
 0x29a   : > { %v731_v55 = vmul.f32 1.442695, %v730_v54 }
 0x29c   : > { %1210 = vpow2.f32 %v731_v55 }
 0x2a6   : > { %v1211_v56 = vpop.eup %1210 }
 0x2a7   : > { %v733_v28 = vadd.f32 1.0, %v1211_v56 }
 0x2a9   : > { %1212 = vrcp.f32 %v733_v28 }
 0x2b3   : > { %v1213_v57 = vpop.eup %1212 }
 0x2b4   : > { %738 = vperm.xlu1 %1196, %v1213_v57  }
 0x2b8   : > { %1197 = vset.pattern.permute.xlu1 %v1532_v1  ;;  %v782_v1 = vsub.s32 5, %v1939_v34 }
 0x2b9   : > { %795 = vperm.xlu1 %1197, %v749_v2  }
 0x2bd   : > { %1198 = vset.pattern.permute.xlu1 %v1534_v4  ;;  %v804_v4 = vsub.s32 2, %v1939_v34 }
 0x2be   : > { %821 = vperm.xlu1 %1198, %v749_v2  }
 0x2c2   : > { %1199 = vset.pattern.permute.xlu1 %v1537_v8 }
 0x2c3   : > { %847 = vperm.xlu1 %1199, %v749_v2  }
 0x2c7   : > { %1200 = vset.pattern.permute.xlu1 %v1535_v5 }
 0x2c8   : > { %857 = vperm.xlu1 %1200, %v854_v58  }
 0x333   : > { %v739_v60 = vpop.permute.xlu1 %738 }
 0x334   : > { %v746_v61 = vrot.slane %v739_v60, %v1964_v44  ;;  %v830_v44 = vsub.s32 3, %v1939_v34 }
 0x336   : > { %v748_v8 = vmul.f32 %v746_v61, %v690_v45 }
 0x338   : > { %v754_v47 = vrot.slane %v748_v8, %v724_v46  ;;  %v758_v0 = vrot.slane %v748_v8, %v757_v36  ;;  %v779_v26 = vrot.slane %v748_v8, %v778_v62  ;;  %v783_v5 = vrot.slane %v748_v8, %v782_v1  ;;  %v796_v3 = vpop.permute.xlu1 %795 }
 0x339   : > { %v805_v9 = vrot.slane %v748_v8, %v804_v4  ;;  %v809_v51 = vrot.slane %v748_v8, %v808_v63  ;;  %v831_v2 = vrot.slane %v748_v8, %v830_v44  ;;  %v835_v22 = vrot.slane %v748_v8, %v834_v10 }
 0x33a   : > { %v764_v29 = vrot.slane %v754_v47, %v724_v46  ;;  %v768_v11 = vrot.slane %v758_v0, %v724_v46  ;;  %v789_v12 = vrot.slane %v779_v26, %v778_v62  ;;  %v793_v13 = vrot.slane %v783_v5, %v778_v62 }
 0x33b   : > { %v815_v45 = vrot.slane %v805_v9, %v804_v4  ;;  %v819_v14 = vrot.slane %v809_v51, %v804_v4  ;;  %v841_v34 = vrot.slane %v831_v2, %v830_v44  ;;  %v845_v15 = vrot.slane %v835_v22, %v830_v44 }
 0x33c   : > { %v774_v16 = vmul.f32 %v772_v59, %v764_v29  ;;  %v775_v17 = vmul.f32 %v772_v59, %v768_v11  ;;  %v798_v19 = vmul.f32 %v796_v3, %v789_v12  ;;  %v799_v20 = vmul.f32 %v796_v3, %v793_v13 }
 0x33d   : > { %v822_v21 = vpop.permute.xlu1 %821 }
 0x33e   : > { %v800_v23 = vadd.f32 %v798_v19, %v774_v16  ;;  %v801_v24 = vadd.f32 %v799_v20, %v775_v17  ;;  %v824_v25 = vmul.f32 %v822_v21, %v815_v45  ;;  %v825_v27 = vmul.f32 %v822_v21, %v819_v14 }
 0x340   : > { %v826_v31 = vadd.f32 %v824_v25, %v800_v23  ;;  %v827_v32 = vadd.f32 %v825_v27, %v801_v24 }
 0x342   : > { %v848_v30 = vpop.permute.xlu1 %847 }
 0x343   : > { %v850_v33 = vmul.f32 %v848_v30, %v841_v34  ;;  %v851_v35 = vmul.f32 %v848_v30, %v845_v15 }
 0x345   : > { %v852_v37 = vadd.f32 %v850_v33, %v826_v31  ;;  %v853_v39 = vadd.f32 %v851_v35, %v827_v32 }
 0x347   : > { %v858_v40 = vpop.permute.xlu1 %857 }
 0x348   : > { %v860_v41 = vadd.f32 %v858_v40, %v852_v37  ;;  %v861_v42 = vadd.f32 %v858_v40, %v853_v39 }
 0x34a   : > { %v862_v43 = vadd.f32 %v860_v41, %v1900_v6  ;;  %v863_v46 = vadd.f32 %v861_v42, %v1904_v7 }
 0x34c   : > { %v866_v18 = vcombine.low %v862_v43, %v863_v46 }
 0x34e   : > { %868 = vst [vmem:[%s438_s19] sm:$0xff] %v866_v18 }
 0x34f   : > { %1453 = shalt.err (!%p1450_p4)
}
 0x350   : > { %s1454_s24 = scalar_lea.hbm %s2068_s28, 128  ;;  %s1458_s27 = scalar_lea.hbm %s2121_s9, 256 }
 0x351   : > { %p1455_p11 = scmp.ne.s32.totalorder %s2068_s28, %s1454_s24  ;;  %p1459_p9 = scmp.lt.u32.totalorder %s2068_s28, %s2121_s9 }
 0x352   : > { %p1460_p7 = scmp.lt.u32.totalorder %s1458_s27, %s1454_s24  ;;  %p1462_p12 = scmp.lt.u32.totalorder %s1454_s24, %s2068_s28 }
 0x353   : > { %p1456_p8 = pnand %p1455_p11, %p2156_p13 }
 0x354   : > { %p1461_p10 = por %p1460_p7, %p1459_p9 }
 0x355   : > { %p1457_p5 = pneg %p1456_p8 }
 0x356   : > { %p1463_p1 = por %p1462_p12, %p1461_p10 }
 0x358   : > { %p1464_p3 = pnand %p1463_p1, %p1457_p5 }
 0x35a   : > { %1467 = shalt.err (!%p1464_p3)
}
 0x35b   : > { %1081 = dma.vmem_to_hbm [thread:$0]  (%p2156_p13), %s2070_s4, 128, %s2068_s28, %s870_s16  }
 0x35c PF: > { %s896_s21 = sand.u32 1, %s1510_s11   ;;  %p2157_p2 = scmp.ne.s32.totalorder %s2131_s18, 0 }
 0x35d   : > { %p2158_p0 = scmp.ge.s32.totalorder %s1522_s14, 2  ;;  %s897_s29 = scalar_lea.sflag [#allocation5], %s896_s21 }
 0x35f   : > { %p1110_p6 = pnand %p2158_p0, %p2157_p2 }
 0x361   : > { %1505 = dma.done.wait (!%p1110_p6), %s897_s29, 128  }
 0x362   : > { %1507 = vsyncadd (!%p1110_p6), %s897_s29, 4294967168  ;;  %p28_p4 = scmp.ge.s32.totalorder %s1801_s22, 4   ;;  %s2159_s11 = smov %s1514_s12 }
 0x363   : > { %s2160_s12 = smov %s1518_s13  ;;  %s2161_s13 = smov %s1813_s10 }
 0x364   : > { %s2162_s14 = smov %s1801_s22  ;;  %30 = sbr.rel (!%p28_p4) target bundleno = 12 (0xc), region = 129 }
 0x36b   :  { %902 = vsyncpa [#allocation4], 1 }
 0x36c   :  { %904 = vsyncpa [#allocation4 + $0x1], 1 }
 0x36d   :  { %905 = vsyncpa [#allocation7], 1 }
 0x36e   :  { %906 = vsyncpa [#allocation10], 1 }
 0x36f   :  { %907 = vsyncpa [#allocation13], 1 }
 0x370   :  { %908 = vsyncpa [#allocation16], 1 }
 0x371   :  { %909 = vsyncpa [#allocation5], 1 }
 0x372   :  { %911 = vsyncpa [#allocation5 + $0x1], 1 }

</bundles_post_ra>
